<compile_context>
chip_gen: v7x
topology: tpu7x:2x2x1
jax: 0.10.0
libtpu: 0.0.40
codegen_flags: <defaults>
</compile_context>

<pallas_src>
import functools

import jax
import jax.numpy as jnp
from jax import lax
from jax.experimental import pallas as pl
from jax.experimental.pallas import tpu as pltpu


# ---------------------------------------------------------------------------
# Kernel A: fused QKV projection (one fat GEMM per row tile, resident weights)
# ---------------------------------------------------------------------------
def _qkv_proj_kernel(x_ref, w_ref, q_ref, k_ref, v_ref, *, num_heads, head_dim):
    x = x_ref[0]                                                       # (tn, C) bf16
    qkv = jnp.dot(x, w_ref[...], preferred_element_type=jnp.float32)  # (tn, 3C) f32
    qkv = qkv.astype(q_ref.dtype)                                      # bf16
    c = num_heads * head_dim
    # Static head split: write lane slabs into per-head (B, H, N, D) outputs so the
    # attention kernel reads clean per-head blocks (no XLA transpose between kernels).
    for h in range(num_heads):
        lo = h * head_dim
        q_ref[0, h] = qkv[:, lo:lo + head_dim]
        k_ref[0, h] = qkv[:, c + lo:c + lo + head_dim]
        v_ref[0, h] = qkv[:, 2 * c + lo:2 * c + lo + head_dim]


# ---------------------------------------------------------------------------
# Kernel B: multi-head attention + output projection (fat steps, full-row softmax)
# ---------------------------------------------------------------------------
def _attn_proj_kernel(q_ref, k_ref, v_ref, wp_ref, bp_ref, o_ref, oacc_sc,
                      *, heads_per_step, n_valid, n_pad):
    """One grid step = (batch b, query tile qi, head-block g)."""
    g = pl.program_id(2)
    n_g = pl.num_programs(2)

    # Reset the output-projection accumulator on the first head block of this (b, qi).
    @pl.when(g == 0)
    def _():
        oacc_sc[...] = jnp.zeros_like(oacc_sc)

    # Mask for zero-padded KV rows (static shapes -> built only when needed).
    if n_valid < n_pad:
        kv_idx = lax.broadcasted_iota(jnp.int32, (1, n_pad), 1)
        kv_mask = kv_idx < n_valid
    else:
        kv_mask = None

    # Unrolled loop over the heads of this block (heads_per_step is small & static).
    for i in range(heads_per_step):
        h = g * heads_per_step + i
        q = q_ref[0, i]                # (tq, D) bf16, softmax scale pre-folded in
        k = k_ref[0, i]                # (N_pad, D) bf16
        v = v_ref[0, i]                # (N_pad, D) bf16

        # Scores: contract the head dim of q and k directly (NT matmul on the MXU).
        s = lax.dot_general(q, k, (((1,), (1,)), ((), ())),
                            preferred_element_type=jnp.float32)        # (tq, N_pad)
        if kv_mask is not None:
            s = jnp.where(kv_mask, s, -jnp.inf)

        # Full-row softmax in f32 (N is ViT-scale; no online-softmax rescales needed).
        m = jnp.max(s, axis=-1, keepdims=True)
        p = jnp.exp(s - m)
        l = jnp.sum(p, axis=-1, keepdims=True)
        head_out = jnp.dot(p.astype(jnp.bfloat16), v,
                           preferred_element_type=jnp.float32)          # (tq, D)
        # TODO(synk): attn_drop is identity (p=0.0); no stochastic dropout implemented.
        head_out = head_out * pl.reciprocal(l, approx=True)

        # concat_h(head_h) @ Wp == sum_h head_h @ Wp[h]: fold this head's projection
        # contribution into the lane-dense (tq, C) accumulator.
        oacc_sc[...] += jnp.dot(head_out.astype(jnp.bfloat16), wp_ref[h],
                                preferred_element_type=jnp.float32)     # (tq, C)

    # Last head block: add bias, cast and store once (lane-dense in C).
    @pl.when(g == n_g - 1)
    def _():
        # TODO(synk): proj_drop is identity (p=0.0).
        o_ref[0] = (oacc_sc[...] + bp_ref[...]).astype(o_ref.dtype)


# ---------------------------------------------------------------------------
# Wrapper
# ---------------------------------------------------------------------------
def _round_up(x, m):
    return (x + m - 1) // m * m


def _pick_q_tile(n_pad):
    if n_pad <= 512:
        return n_pad
    for t in (512, 384, 256, 128):
        if n_pad % t == 0:
            return t
    return n_pad


def _pick_heads_per_step(num_heads, n_pad, head_dim):
    """All heads per step unless the double-buffered bf16 K/V blocks get too big."""
    budget = 12 * 1024 * 1024
    per_head = 2 * 2 * n_pad * head_dim * 2     # (k + v) x double-buffer x bf16
    cap = max(1, budget // max(per_head, 1))
    for d in range(num_heads, 0, -1):
        if num_heads % d == 0 and d <= cap:
            return d
    return 1


def attention(x, w_qkv, w_proj, b_proj, *, num_heads):
    """x: (B, N, C); w_qkv: (C, 3C) pre-transposed (columns ordered [3, H, D]);
    w_proj: (C, C); b_proj: (1, C)."""
    B, N, C = x.shape
    H = num_heads
    assert C % H == 0
    D = C // H
    scale = D ** (-0.5)
    out_dtype = x.dtype

    # --- pad the sequence so tiles are (8, 128)-friendly ---
    n_pad = _round_up(N, 8) if N <= 512 else _round_up(N, 128)
    tq = _pick_q_tile(n_pad)
    # Best effort: keep >= 2 parallel grid steps so both TCs get work on v7x.
    if B * (n_pad // tq) < 2 and tq >= 16 and tq % 16 == 0:
        tq //= 2
    n_q = n_pad // tq
    tn = tq

    hb = _pick_heads_per_step(H, n_pad, D)
    n_g = H // hb

    # --- weight / input prep (layout + precision), done once wrapper-side ---
    x_bf = x.astype(jnp.bfloat16)
    if n_pad != N:
        x_bf = jnp.pad(x_bf, ((0, 0), (0, n_pad - N), (0, 0)))
    # Fold the softmax scale into the q columns (first C columns of w_qkv).
    w_qkv_f = w_qkv.astype(jnp.float32)
    w_qkv_bf = jnp.concatenate([w_qkv_f[:, :C] * scale, w_qkv_f[:, C:]],
                               axis=1).astype(jnp.bfloat16)             # (C, 3C)
    # proj rows h*D:(h+1)*D multiply head h of the concatenated attention output.
    w_p = w_proj.reshape(H, D, C).astype(jnp.bfloat16)                  # (H, D, C)
    b_p = b_proj.reshape(1, C).astype(jnp.float32)

    # ---------------- kernel A: qkv projection ----------------
    est_a = (2 * tn * C * 2              # x blocks (bf16, double-buffered)
             + 2 * 3 * C * C * 2         # resident qkv weights (2 buffers worst case)
             + 3 * 2 * H * tn * D * 2    # q/k/v output blocks (bf16, double-buffered)
             + 2 * tn * 3 * C * 4)       # f32 qkv intermediate
    vmem_a = int(min(max(2 * est_a, 32 << 20), 56 << 20))

    q, k, v = pl.pallas_call(
        functools.partial(_qkv_proj_kernel, num_heads=H, head_dim=D),
        out_shape=tuple(jax.ShapeDtypeStruct((B, H, n_pad, D), jnp.bfloat16)
                        for _ in range(3)),
        grid=(B, n_pad // tn),
        in_specs=[
            pl.BlockSpec((1, tn, C), lambda b, ni: (b, ni, 0)),          # x rows
            pl.BlockSpec((C, 3 * C), lambda b, ni: (0, 0)),              # W_qkv resident
        ],
        out_specs=tuple(pl.BlockSpec((1, H, tn, D), lambda b, ni: (b, 0, ni, 0))
                        for _ in range(3)),
        compiler_params=pltpu.CompilerParams(
            dimension_semantics=("parallel", "parallel"),
            vmem_limit_bytes=vmem_a),
    )(x_bf, w_qkv_bf)

    # ---------------- kernel B: attention + output projection ----------------
    osize = jnp.dtype(out_dtype).itemsize
    est_b = (2 * hb * tq * D * 2             # q blocks
             + 2 * 2 * hb * n_pad * D * 2    # k / v blocks
             + 2 * H * D * C * 2             # resident proj weights
             + 2 * tq * C * osize            # output blocks
             + tq * C * 4                    # projection accumulator scratch
             + 4 * tq * n_pad * 4)           # score / prob f32 transients
    vmem_b = int(min(max(2 * est_b, 32 << 20), 56 << 20))

    out = pl.pallas_call(
        functools.partial(_attn_proj_kernel, heads_per_step=hb,
                          n_valid=N, n_pad=n_pad),
        out_shape=jax.ShapeDtypeStruct((B, n_pad, C), out_dtype),
        grid=(B, n_q, n_g),
        in_specs=[
            pl.BlockSpec((1, hb, tq, D), lambda b, qi, g: (b, g, qi, 0)),     # q
            pl.BlockSpec((1, hb, n_pad, D), lambda b, qi, g: (b, g, 0, 0)),   # k (full rows)
            pl.BlockSpec((1, hb, n_pad, D), lambda b, qi, g: (b, g, 0, 0)),   # v (full rows)
            pl.BlockSpec((H, D, C), lambda b, qi, g: (0, 0, 0)),              # W_proj resident
            pl.BlockSpec((1, C), lambda b, qi, g: (0, 0)),                    # proj bias
        ],
        out_specs=pl.BlockSpec((1, tq, C), lambda b, qi, g: (b, qi, 0)),
        scratch_shapes=[pltpu.VMEM((tq, C), jnp.float32)],
        compiler_params=pltpu.CompilerParams(
            dimension_semantics=("parallel", "parallel", "arbitrary"),
            vmem_limit_bytes=vmem_b),
    )(q, k, v, w_p, b_p)

    if n_pad != N:
        out = out[:, :N, :]
    return out


def attention_ref(x, w_qkv, w_proj, b_proj, *, num_heads):
    """Pure-JAX f32 reference mirroring the PyTorch forward."""
    B, N, C = x.shape
    D = C // num_heads
    scale = D ** (-0.5)
    qkv = x @ w_qkv                                        # (B, N, 3C)
    qkv = qkv.reshape(B, N, 3, num_heads, D).transpose(2, 0, 3, 1, 4)
    q, k, v = qkv[0], qkv[1], qkv[2]                       # (B, H, N, D)
    attn = (q @ jnp.swapaxes(k, -2, -1)) * scale           # (B, H, N, N)
    attn = jax.nn.softmax(attn, axis=-1)
    out = (attn @ v).transpose(0, 2, 1, 3).reshape(B, N, C)
    return out @ w_proj + b_proj[0]


if __name__ == "__main__":
    key = jax.random.PRNGKey(0)
    kx, kq, kp, kb = jax.random.split(key, 4)

    # Case 1: small aligned shapes (B=2, N=8, C=32, H=4 -> head_dim 8).
    B, N, C, H = 2, 8, 32, 4
    x = jax.random.normal(kx, (B, N, C), dtype=jnp.float32)
    # qkv_bias=False (module default) -> no qkv bias; proj has a bias.
    w_qkv = 0.1 * jax.random.normal(kq, (C, 3 * C), dtype=jnp.float32)
    w_proj = 0.1 * jax.random.normal(kp, (C, C), dtype=jnp.float32)
    b_proj = 0.1 * jax.random.normal(kb, (1, C), dtype=jnp.float32)

    out = attention(x, w_qkv, w_proj, b_proj, num_heads=H)
    out = jax.block_until_ready(out)
    ref = attention_ref(x, w_qkv, w_proj, b_proj, num_heads=H)
    assert out.shape == (B, N, C)
    # bf16 MXU operands + approx reciprocal -> loosened tolerance vs f32 reference.
    assert jnp.allclose(out, ref, atol=5e-2, rtol=5e-2), "mismatch vs reference (case 1)"

    # Case 2: ragged N (exercises the padding + KV-mask path).
    N2 = 13
    x2 = jax.random.normal(jax.random.PRNGKey(1), (B, N2, C), dtype=jnp.float32)
    out2 = attention(x2, w_qkv, w_proj, b_proj, num_heads=H)
    out2 = jax.block_until_ready(out2)
    ref2 = attention_ref(x2, w_qkv, w_proj, b_proj, num_heads=H)
    assert out2.shape == (B, N2, C)
    assert jnp.allclose(out2, ref2, atol=5e-2, rtol=5e-2), "mismatch vs reference (case 2)"

    print("KERNEL_OK")
</pallas_src>

<mosaic_0001>
module attributes {stable_mosaic.version = 11 : i64} {
  func.func @_qkv_proj_kernel(%arg0: i32, %arg1: i32, %arg2: memref<1x8x32xbf16, #tpu.memory_space<vmem>>, %arg3: memref<32x96xbf16, #tpu.memory_space<vmem>>, %arg4: memref<1x4x8x8xbf16, #tpu.memory_space<vmem>>, %arg5: memref<1x4x8x8xbf16, #tpu.memory_space<vmem>>, %arg6: memref<1x4x8x8xbf16, #tpu.memory_space<vmem>>) attributes {dimension_semantics = [#tpu.dimension_semantics<parallel>, #tpu.dimension_semantics<parallel>], iteration_bounds = array<i64: 2, 1>, scalar_prefetch = 0 : i64, scratch_operands = 0 : i64, tpu.core_type = #tpu.core_type<tc>, window_params = [{transform_indices = @transform_0, window_bounds = array<i64: 1, 8, 32>}, {pipeline_mode = #tpu.pipeline_mode<synchronous>, transform_indices = @transform_1, window_bounds = array<i64: 32, 96>}, {transform_indices = @transform_2, window_bounds = array<i64: 1, 4, 8, 8>}, {transform_indices = @transform_3, window_bounds = array<i64: 1, 4, 8, 8>}, {transform_indices = @transform_4, window_bounds = array<i64: 1, 4, 8, 8>}]} {
    %c0 = arith.constant 0 : index
    %c0_0 = arith.constant 0 : index
    %c0_1 = arith.constant 0 : index
    %0 = vector.load %arg2[%c0, %c0_0, %c0_1] : memref<1x8x32xbf16, #tpu.memory_space<vmem>>, vector<1x8x32xbf16>
    %1 = vector.shape_cast %0 : vector<1x8x32xbf16> to vector<8x32xbf16>
    %c0_2 = arith.constant 0 : index
    %c0_3 = arith.constant 0 : index
    %2 = vector.load %arg3[%c0_2, %c0_3] : memref<32x96xbf16, #tpu.memory_space<vmem>>, vector<32x96xbf16>
    %cst = arith.constant dense<0.000000e+00> : vector<8x96xf32>
    %3 = tpu.matmul %1, %2, %cst {dimension_numbers = #tpu.dot_dimension_numbers<[1], [0], [0], [1], [0, 0, 1, 1], [], []>} : vector<8x32xbf16>, vector<32x96xbf16>, vector<8x96xf32> -> vector<8x96xf32>
    %4 = arith.truncf %3 : vector<8x96xf32> to vector<8x96xbf16>
    %5 = vector.extract_strided_slice %4 {offsets = [0, 0], sizes = [8, 8], strides = [1, 1]} : vector<8x96xbf16> to vector<8x8xbf16>
    %c0_4 = arith.constant 0 : index
    %c0_5 = arith.constant 0 : index
    %c0_6 = arith.constant 0 : index
    %c0_7 = arith.constant 0 : index
    %6 = vector.load %arg4[%c0_4, %c0_5, %c0_6, %c0_7] : memref<1x4x8x8xbf16, #tpu.memory_space<vmem>>, vector<1x1x8x8xbf16>
    %7 = vector.shape_cast %6 : vector<1x1x8x8xbf16> to vector<8x8xbf16>
    %8 = vector.shape_cast %5 : vector<8x8xbf16> to vector<1x1x8x8xbf16>
    tpu.vector_store %arg4[%c0_4, %c0_5, %c0_6, %c0_7], %8 {strides = array<i32>} : memref<1x4x8x8xbf16, #tpu.memory_space<vmem>>, vector<1x1x8x8xbf16>,
    %9 = vector.extract_strided_slice %4 {offsets = [0, 32], sizes = [8, 8], strides = [1, 1]} : vector<8x96xbf16> to vector<8x8xbf16>
    %c0_8 = arith.constant 0 : index
    %c0_9 = arith.constant 0 : index
    %c0_10 = arith.constant 0 : index
    %c0_11 = arith.constant 0 : index
    %10 = vector.load %arg5[%c0_8, %c0_9, %c0_10, %c0_11] : memref<1x4x8x8xbf16, #tpu.memory_space<vmem>>, vector<1x1x8x8xbf16>
    %11 = vector.shape_cast %10 : vector<1x1x8x8xbf16> to vector<8x8xbf16>
    %12 = vector.shape_cast %9 : vector<8x8xbf16> to vector<1x1x8x8xbf16>
    tpu.vector_store %arg5[%c0_8, %c0_9, %c0_10, %c0_11], %12 {strides = array<i32>} : memref<1x4x8x8xbf16, #tpu.memory_space<vmem>>, vector<1x1x8x8xbf16>,
    %13 = vector.extract_strided_slice %4 {offsets = [0, 64], sizes = [8, 8], strides = [1, 1]} : vector<8x96xbf16> to vector<8x8xbf16>
    %c0_12 = arith.constant 0 : index
    %c0_13 = arith.constant 0 : index
    %c0_14 = arith.constant 0 : index
    %c0_15 = arith.constant 0 : index
    %14 = vector.load %arg6[%c0_12, %c0_13, %c0_14, %c0_15] : memref<1x4x8x8xbf16, #tpu.memory_space<vmem>>, vector<1x1x8x8xbf16>
    %15 = vector.shape_cast %14 : vector<1x1x8x8xbf16> to vector<8x8xbf16>
    %16 = vector.shape_cast %13 : vector<8x8xbf16> to vector<1x1x8x8xbf16>
    tpu.vector_store %arg6[%c0_12, %c0_13, %c0_14, %c0_15], %16 {strides = array<i32>} : memref<1x4x8x8xbf16, #tpu.memory_space<vmem>>, vector<1x1x8x8xbf16>,
    %17 = vector.extract_strided_slice %4 {offsets = [0, 8], sizes = [8, 8], strides = [1, 1]} : vector<8x96xbf16> to vector<8x8xbf16>
    %c0_16 = arith.constant 0 : index
    %c1 = arith.constant 1 : index
    %c0_17 = arith.constant 0 : index
    %c0_18 = arith.constant 0 : index
    %18 = vector.load %arg4[%c0_16, %c1, %c0_17, %c0_18] : memref<1x4x8x8xbf16, #tpu.memory_space<vmem>>, vector<1x1x8x8xbf16>
    %19 = vector.shape_cast %18 : vector<1x1x8x8xbf16> to vector<8x8xbf16>
    %20 = vector.shape_cast %17 : vector<8x8xbf16> to vector<1x1x8x8xbf16>
    tpu.vector_store %arg4[%c0_16, %c1, %c0_17, %c0_18], %20 {strides = array<i32>} : memref<1x4x8x8xbf16, #tpu.memory_space<vmem>>, vector<1x1x8x8xbf16>,
    %21 = vector.extract_strided_slice %4 {offsets = [0, 40], sizes = [8, 8], strides = [1, 1]} : vector<8x96xbf16> to vector<8x8xbf16>
    %c0_19 = arith.constant 0 : index
    %c1_20 = arith.constant 1 : index
    %c0_21 = arith.constant 0 : index
    %c0_22 = arith.constant 0 : index
    %22 = vector.load %arg5[%c0_19, %c1_20, %c0_21, %c0_22] : memref<1x4x8x8xbf16, #tpu.memory_space<vmem>>, vector<1x1x8x8xbf16>
    %23 = vector.shape_cast %22 : vector<1x1x8x8xbf16> to vector<8x8xbf16>
    %24 = vector.shape_cast %21 : vector<8x8xbf16> to vector<1x1x8x8xbf16>
    tpu.vector_store %arg5[%c0_19, %c1_20, %c0_21, %c0_22], %24 {strides = array<i32>} : memref<1x4x8x8xbf16, #tpu.memory_space<vmem>>, vector<1x1x8x8xbf16>,
    %25 = vector.extract_strided_slice %4 {offsets = [0, 72], sizes = [8, 8], strides = [1, 1]} : vector<8x96xbf16> to vector<8x8xbf16>
    %c0_23 = arith.constant 0 : index
    %c1_24 = arith.constant 1 : index
    %c0_25 = arith.constant 0 : index
    %c0_26 = arith.constant 0 : index
    %26 = vector.load %arg6[%c0_23, %c1_24, %c0_25, %c0_26] : memref<1x4x8x8xbf16, #tpu.memory_space<vmem>>, vector<1x1x8x8xbf16>
    %27 = vector.shape_cast %26 : vector<1x1x8x8xbf16> to vector<8x8xbf16>
    %28 = vector.shape_cast %25 : vector<8x8xbf16> to vector<1x1x8x8xbf16>
    tpu.vector_store %arg6[%c0_23, %c1_24, %c0_25, %c0_26], %28 {strides = array<i32>} : memref<1x4x8x8xbf16, #tpu.memory_space<vmem>>, vector<1x1x8x8xbf16>,
    %29 = vector.extract_strided_slice %4 {offsets = [0, 16], sizes = [8, 8], strides = [1, 1]} : vector<8x96xbf16> to vector<8x8xbf16>
    %c0_27 = arith.constant 0 : index
    %c2 = arith.constant 2 : index
    %c0_28 = arith.constant 0 : index
    %c0_29 = arith.constant 0 : index
    %30 = vector.load %arg4[%c0_27, %c2, %c0_28, %c0_29] : memref<1x4x8x8xbf16, #tpu.memory_space<vmem>>, vector<1x1x8x8xbf16>
    %31 = vector.shape_cast %30 : vector<1x1x8x8xbf16> to vector<8x8xbf16>
    %32 = vector.shape_cast %29 : vector<8x8xbf16> to vector<1x1x8x8xbf16>
    tpu.vector_store %arg4[%c0_27, %c2, %c0_28, %c0_29], %32 {strides = array<i32>} : memref<1x4x8x8xbf16, #tpu.memory_space<vmem>>, vector<1x1x8x8xbf16>,
    %33 = vector.extract_strided_slice %4 {offsets = [0, 48], sizes = [8, 8], strides = [1, 1]} : vector<8x96xbf16> to vector<8x8xbf16>
    %c0_30 = arith.constant 0 : index
    %c2_31 = arith.constant 2 : index
    %c0_32 = arith.constant 0 : index
    %c0_33 = arith.constant 0 : index
    %34 = vector.load %arg5[%c0_30, %c2_31, %c0_32, %c0_33] : memref<1x4x8x8xbf16, #tpu.memory_space<vmem>>, vector<1x1x8x8xbf16>
    %35 = vector.shape_cast %34 : vector<1x1x8x8xbf16> to vector<8x8xbf16>
    %36 = vector.shape_cast %33 : vector<8x8xbf16> to vector<1x1x8x8xbf16>
    tpu.vector_store %arg5[%c0_30, %c2_31, %c0_32, %c0_33], %36 {strides = array<i32>} : memref<1x4x8x8xbf16, #tpu.memory_space<vmem>>, vector<1x1x8x8xbf16>,
    %37 = vector.extract_strided_slice %4 {offsets = [0, 80], sizes = [8, 8], strides = [1, 1]} : vector<8x96xbf16> to vector<8x8xbf16>
    %c0_34 = arith.constant 0 : index
    %c2_35 = arith.constant 2 : index
    %c0_36 = arith.constant 0 : index
    %c0_37 = arith.constant 0 : index
    %38 = vector.load %arg6[%c0_34, %c2_35, %c0_36, %c0_37] : memref<1x4x8x8xbf16, #tpu.memory_space<vmem>>, vector<1x1x8x8xbf16>
    %39 = vector.shape_cast %38 : vector<1x1x8x8xbf16> to vector<8x8xbf16>
    %40 = vector.shape_cast %37 : vector<8x8xbf16> to vector<1x1x8x8xbf16>
    tpu.vector_store %arg6[%c0_34, %c2_35, %c0_36, %c0_37], %40 {strides = array<i32>} : memref<1x4x8x8xbf16, #tpu.memory_space<vmem>>, vector<1x1x8x8xbf16>,
    %41 = vector.extract_strided_slice %4 {offsets = [0, 24], sizes = [8, 8], strides = [1, 1]} : vector<8x96xbf16> to vector<8x8xbf16>
    %c0_38 = arith.constant 0 : index
    %c3 = arith.constant 3 : index
    %c0_39 = arith.constant 0 : index
    %c0_40 = arith.constant 0 : index
    %42 = vector.load %arg4[%c0_38, %c3, %c0_39, %c0_40] : memref<1x4x8x8xbf16, #tpu.memory_space<vmem>>, vector<1x1x8x8xbf16>
    %43 = vector.shape_cast %42 : vector<1x1x8x8xbf16> to vector<8x8xbf16>
    %44 = vector.shape_cast %41 : vector<8x8xbf16> to vector<1x1x8x8xbf16>
    tpu.vector_store %arg4[%c0_38, %c3, %c0_39, %c0_40], %44 {strides = array<i32>} : memref<1x4x8x8xbf16, #tpu.memory_space<vmem>>, vector<1x1x8x8xbf16>,
    %45 = vector.extract_strided_slice %4 {offsets = [0, 56], sizes = [8, 8], strides = [1, 1]} : vector<8x96xbf16> to vector<8x8xbf16>
    %c0_41 = arith.constant 0 : index
    %c3_42 = arith.constant 3 : index
    %c0_43 = arith.constant 0 : index
    %c0_44 = arith.constant 0 : index
    %46 = vector.load %arg5[%c0_41, %c3_42, %c0_43, %c0_44] : memref<1x4x8x8xbf16, #tpu.memory_space<vmem>>, vector<1x1x8x8xbf16>
    %47 = vector.shape_cast %46 : vector<1x1x8x8xbf16> to vector<8x8xbf16>
    %48 = vector.shape_cast %45 : vector<8x8xbf16> to vector<1x1x8x8xbf16>
    tpu.vector_store %arg5[%c0_41, %c3_42, %c0_43, %c0_44], %48 {strides = array<i32>} : memref<1x4x8x8xbf16, #tpu.memory_space<vmem>>, vector<1x1x8x8xbf16>,
    %49 = vector.extract_strided_slice %4 {offsets = [0, 88], sizes = [8, 8], strides = [1, 1]} : vector<8x96xbf16> to vector<8x8xbf16>
    %c0_45 = arith.constant 0 : index
    %c3_46 = arith.constant 3 : index
    %c0_47 = arith.constant 0 : index
    %c0_48 = arith.constant 0 : index
    %50 = vector.load %arg6[%c0_45, %c3_46, %c0_47, %c0_48] : memref<1x4x8x8xbf16, #tpu.memory_space<vmem>>, vector<1x1x8x8xbf16>
    %51 = vector.shape_cast %50 : vector<1x1x8x8xbf16> to vector<8x8xbf16>
    %52 = vector.shape_cast %49 : vector<8x8xbf16> to vector<1x1x8x8xbf16>
    tpu.vector_store %arg6[%c0_45, %c3_46, %c0_47, %c0_48], %52 {strides = array<i32>} : memref<1x4x8x8xbf16, #tpu.memory_space<vmem>>, vector<1x1x8x8xbf16>,
    return
  }
  func.func @transform_0(%arg0: i32, %arg1: i32) -> (i32, i32, i32) {
    %c0_i32 = arith.constant 0 : i32
    %c0_i32_0 = arith.constant 0 : i32
    return %arg0, %arg1, %c0_i32 : i32, i32, i32
  }
  func.func @transform_1(%arg0: i32, %arg1: i32) -> (i32, i32) {
    %c0_i32 = arith.constant 0 : i32
    %c0_i32_0 = arith.constant 0 : i32
    %c0_i32_1 = arith.constant 0 : i32
    return %c0_i32, %c0_i32_0 : i32, i32
  }
  func.func @transform_2(%arg0: i32, %arg1: i32) -> (i32, i32, i32, i32) {
    %c0_i32 = arith.constant 0 : i32
    %c0_i32_0 = arith.constant 0 : i32
    %c0_i32_1 = arith.constant 0 : i32
    return %arg0, %c0_i32, %arg1, %c0_i32_0 : i32, i32, i32, i32
  }
  func.func @transform_3(%arg0: i32, %arg1: i32) -> (i32, i32, i32, i32) {
    %c0_i32 = arith.constant 0 : i32
    %c0_i32_0 = arith.constant 0 : i32
    %c0_i32_1 = arith.constant 0 : i32
    return %arg0, %c0_i32, %arg1, %c0_i32_0 : i32, i32, i32, i32
  }
  func.func @transform_4(%arg0: i32, %arg1: i32) -> (i32, i32, i32, i32) {
    %c0_i32 = arith.constant 0 : i32
    %c0_i32_0 = arith.constant 0 : i32
    %c0_i32_1 = arith.constant 0 : i32
    return %arg0, %c0_i32, %arg1, %c0_i32_0 : i32, i32, i32, i32
  }
}

</mosaic_0001>

<bundles_post_ra>
// kernel: tpu_custom_call.1
= control target key start
LH: loop header
LB: loop body
LE: loop exit
PB: predicated region body
PF: predicated region fallthrough
CT: control target
= control target key end

     0   :  { %10 = vsyncpa [#allocation3], 0  ;;  %s1337_s0 = inlined_call_operand.hbm [shape: bf16[2,8,32], index: 0, kind: input, shape index: {}]   ;;  %s1338_s1 = inlined_call_operand.hbm [shape: bf16[32,96], index: 1, kind: input, shape index: {}]   ;;  %s1339_s2 = inlined_call_operand.hbm [shape: bf16[2,4,8,8], index: 2, kind: output, shape index: {0}]   ;;  %s1340_s3 = inlined_call_operand.hbm [shape: bf16[2,4,8,8], index: 3, kind: output, shape index: {1}]   ;;  %s1341_s4 = inlined_call_operand.hbm [shape: bf16[2,4,8,8], index: 4, kind: output, shape index: {2}]  }
   0x1   :  { %12 = vsyncpa [#allocation3 + $0x1], 0 }
   0x2   :  { %13 = vsyncpa [#allocation6], 0 }
   0x3   :  { %14 = vsyncpa [#allocation4], 0 }
   0x4   :  { %16 = vsyncpa [#allocation4 + $0x1], 0 }
   0x5   :  { %17 = vsyncpa [#allocation9], 0 }
   0x6   :  { %19 = vsyncpa [#allocation9 + $0x1], 0  ;;  %s1011_s15 = smov 0   ;;  %s1013_s16 = smov 0  }
   0x7   :  { %s1015_s17 = smov 0   ;;  %s1017_s18 = smov 0  }
   0x8   :  { %s1019_s19 = smov 0   ;;  %s1021_s20 = smov 0  }
   0x9 LB: > { %s1042_s21 = sadd.s32 4294967295, %s963_s20   ;;  %s1345_s22 = sadd.s32 4294967294, %s963_s20   ;;  %s963_s20 = sphi %s1021_s20, %s25_s20   ;;  %s959_s19 = sphi %s1019_s19, %s1366_s19   ;;  %s955_s18 = sphi %s1017_s18, %s1365_s18   ;;  %s951_s17 = sphi %s1015_s17, %s1364_s17   ;;  %s947_s16 = sphi %s1013_s16, %s1363_s16   ;;  %s943_s15 = sphi %s1011_s15, %s1362_s15  }
   0xa   : > { %p59_p0 = scmp.ne.s32.totalorder %s947_s16, %s943_s15  ;;  %p1342_p1 = scmp.eq.s32.totalorder %s1042_s21, 0 }
   0xb   : > { %p112_p3 = scmp.eq.s32.totalorder %s1345_s22, 1  ;;  %p608_p5 = scmp.ge.s32.totalorder %s963_s20, 1 }
   0xc   : > { %p1053_p4 = por %p1342_p1, %p59_p0  ;;  %p175_p7 = scmp.lt.s32.totalorder %s963_s20, 3 }
   0xd   : > { %p1058_p6 = por %p112_p3, %p59_p0  ;;  %s965_s26 = smov [#allocation5]  }
   0xe   : > { %s1346_s23 = scalar_select %p1053_p4, 1, 0 }
   0xf   : > { %s1347_s24 = scalar_select %p1058_p6, 1, 0 }
  0x10   : > { %p1063_p8 = pnand %p608_p5, %p175_p7  ;;  %s187_s27 = sshll.u32 %s965_s26, 4  ;;  %s188_s27 = int_to_ptr.vmem [resolvable:$true] %s187_s27 }
  0x11   : > { %s37_s29 = sadd.s32 1, %s959_s19  ;;  %s759_s6 = scalar_lea.hbm %s1338_s1, 256 }
  0x12   : > { %s1348_s25 = scalar_select %p1063_p8, 1, 0 }
  0x13   : > { %p670_p9 = pneg %p1063_p8  ;;  %p760_p12 = scmp.ne.s32.totalorder %s1338_s1, %s759_s6 }
  0x14   : > { %p766_p5 = scmp.lt.u32.totalorder %s759_s6, %s1338_s1 }
  0x15   : > { %p1072_p11 = pnand %p670_p9, %p1342_p1 }
  0x17   : > { %p761_p13 = pneg %p1072_p11 }
  0x19   : > { %p762_p0 = pnand %p761_p13, %p760_p12 }
  0x1b   : > { %p763_p3 = pneg %p762_p0 }
  0x1d   : > { %p768_p7 = pnand %p766_p5, %p763_p3 }
  0x1f   : > { %771 = shalt.err (!%p768_p7)
}
  0x20   : > { %s772_s11 = scalar_lea.vmem %s188_s27, 256  ;;  %p780_p2 = scmp.lt.s32.totalorder %s188_s27, %s188_s27 }
  0x21   : > { %p773_p9 = scmp.ne.s32.totalorder %s188_s27, %s772_s11  ;;  %p781_p6 = scmp.lt.s32.totalorder %s772_s11, %s772_s11 }
  0x23   : > { %p775_p10 = pnand %p773_p9, %p761_p13  ;;  %p782_p4 = por %p781_p6, %p780_p2 }
  0x25   : > { %p776_p1 = pneg %p775_p10 }
  0x27   : > { %p783_p8 = pnand %p782_p4, %p776_p1 }
  0x29   : > { %786 = shalt.err (!%p783_p8)
}
  0x2a   : > { %s966_s12 = smov 64   ;;  %s967_s13 = smov 4  }
  0x2b   : > { %673 = dma.hbm_to_vmem [thread:$0]  (!%p1072_p11), %s1338_s1, 256, %s188_s27, [#allocation6], %s966_s12, %s966_s12, %s967_s13  }
  0x2c   : > { %p39_p1 = scmp.ge.s32.totalorder %s37_s29, 2  ;;  %s46_s30 = sadd.s32 1, %s951_s17 }
  0x2d   : > { %p53_p2 = scmp.ne.s32.totalorder %s951_s17, %s947_s16  ;;  %p54_p4 = scmp.eq.s32.totalorder %s963_s20, 0 }
  0x2e   : > { %s1368_s29 = smov (%p39_p1, %s37_s29), 0  ;;  %p1351_p8 = scmp.eq.s32.totalorder %s1042_s21, 1 }
  0x2f   : > { %p1099_p6 = por %p54_p4, %p53_p2  ;;  %s41_s28 = ssub.s32 %s959_s19, %s1368_s29 }
  0x30   : > { %p1105_p10 = por %p1351_p8, %p53_p2  ;;  %p689_p12 = scmp.lt.s32.totalorder %s963_s20, 2 }
  0x31   : > { %p44_p11 = scmp.eq.s32.totalorder %s41_s28, 0  ;;  %s201_s27 = sand.u32 1, %s951_s17  }
  0x32   : > { %s611_s7 = sshll.u32 %s201_s27, 2  ;;  %s612_s9 = sshll.u32 %s959_s19, 6 }
  0x33   : > { %s1114_s8 = scalar_select %p44_p11, %s951_s17, %s46_s30  }
  0x34   : > { %s1120_s12 = scalar_lea.hbm %s1337_s0, %s612_s9  ;;  %s205_s13 = scalar_lea.vmem [#allocation2], %s611_s7 }
  0x35   : > { %s213_s14 = sshll.u32 %s205_s13, 4  ;;  %p1126_p13 = pnand %p689_p12, %p1099_p6  ;;  %s1122_s14 = int_to_ptr.vmem [resolvable:$true] %s213_s14 }
  0x36   : > { %s202_s30 = scalar_lea.sflag [#allocation3], %s201_s27  ;;  %s787_s28 = scalar_lea.hbm %s1120_s12, 64 }
  0x37   : > { %p788_p0 = scmp.ne.s32.totalorder %s1120_s12, %s787_s28  ;;  %p789_p3 = pneg %p1126_p13 }
  0x38   : > { %s792_s10 = scalar_lea.hbm %s1337_s0, 128  ;;  %p793_p9 = scmp.lt.u32.totalorder %s1120_s12, %s1337_s0 }
  0x39   : > { %p790_p5 = pnand %p789_p3, %p788_p0  ;;  %p794_p1 = scmp.lt.u32.totalorder %s792_s10, %s787_s28 }
  0x3a   : > { %p796_p4 = scmp.lt.u32.totalorder %s787_s28, %s1120_s12 }
  0x3b   : > { %p791_p7 = pneg %p790_p5  ;;  %p795_p2 = por %p794_p1, %p793_p9 }
  0x3d   : > { %p797_p6 = por %p796_p4, %p795_p2 }
  0x3f   : > { %p798_p8 = pnand %p797_p6, %p791_p7 }
  0x41   : > { %801 = shalt.err (!%p798_p8)
}
  0x42   : > { %s802_s27 = scalar_lea.vmem %s1122_s14, 64  ;;  %s968_s13 = smov [#allocation2]  }
  0x43   : > { %p803_p12 = scmp.ne.s32.totalorder %s1122_s14, %s802_s27  ;;  %s807_s7 = sshll.u32 %s968_s13, 4  ;;  %s808_s7 = int_to_ptr.vmem [resolvable:$false] %s807_s7 }
  0x44   : > { %s809_s9 = scalar_lea.vmem %s808_s7, 128  ;;  %p810_p5 = scmp.lt.s32.totalorder %s1122_s14, %s808_s7 }
  0x45   : > { %p805_p11 = pnand %p803_p12, %p789_p3  ;;  %p811_p9 = scmp.lt.s32.totalorder %s809_s9, %s802_s27 }
  0x47   : > { %p806_p0 = pneg %p805_p11  ;;  %p812_p1 = por %p811_p9, %p810_p5 }
  0x49   : > { %p813_p2 = pnand %p812_p1, %p806_p0 }
  0x4b   : > { %816 = shalt.err (!%p813_p2)
}
  0x4c   : > { %677 = dma.hbm_to_vmem [thread:$0]  (!%p1126_p13), %s1120_s12, 64, %s1122_s14, %s202_s30  }
  0x4d   : > { %p1354_p7 = scmp.ne.s32.totalorder %s1348_s25, 0 }
  0x4e   : > { %s1158_s28 = sand.u32 (!%p1354_p7), 1, %s947_s16   ;;  %p1355_p3 = scmp.ne.s32.totalorder (!%p1354_p7), %s1346_s23, 0 }
  0x4f   : > { %222 = sbr.rel (%p1354_p7) target bundleno = 494 (0x1ee), region = 28  ;;  %s614_s10 = sshll.u32 (!%p1354_p7), %s1158_s28, 2 }
  0x50   : > { %s225_s5 = scalar_lea.sflag (!%p1354_p7), [#allocation3], %s1158_s28  ;;  %s228_s11 = scalar_lea.vmem (!%p1354_p7), [#allocation2], %s614_s10 }
  0x56   : > { %926 = dma.done.wait (%p1355_p3), %s225_s5, 64  }
  0x57   : > { %928 = vsyncadd (%p1355_p3), %s225_s5, 4294967232  ;;  %p1356_p4 = scmp.eq.s32.totalorder %s1042_s21, 0 }
  0x59   : > { %930 = dma.done.wait (%p1356_p4), [#allocation6], 256   ;;  %p1357_p13 = pmov %p1356_p4 }
  0x5a   : > { %v969_v0 = vmov 0.0   ;;  %vm970_vm0 = vmmov 0   ;;  %v757_v1 = vld [vmem:[#allocation5] sm:$0xff]   ;;  %v758_v2 = vld [vmem:[#allocation5 + $0x8] sm:$0xff]   ;;  %v268_v3 = vld [vmem:[%s228_s11] sm:$0xf] }
  0x5b   : > { %932 = vsyncadd (%p1357_p13), [#allocation6], 4294967040  ;;  %650 = vmatprep.subr.bf16.mxu0 %v969_v0  ;;  %654 = vmatprep.mubr.msk.bf16.mxu0 %vm970_vm0, %v969_v0  ;;  %vm285_vm1 = vcmask 261120   ;;  %s1171_s23 = sshll.u32 %s1158_s28, 4  ;;  %vm330_vm2 = vcmask 60416   ;;  %s971_s25 = smov 80  }
  0x5c   : > { %651 = vmatpush3.bf16.msra.mxu0 %v757_v1  ;;  %s972_s12 = smov 96   ;;  %s1174_s14 = scalar_lea.vmem [#allocation7], %s1171_s23 }
  0x5d   : > { %652 = vmatprep.subr.bf16.mxu0 %v969_v0  ;;  %s973_s26 = smov 72   ;;  %s974_s30 = smov 88  }
  0x5e   : > { %s975_s27 = smov 120   ;;  %s976_s13 = smov 64  }
  0x5f   : > { %s977_s7 = smov 112   ;;  %s978_s9 = smov 56  }
  0x60   : > { %653 = vmatpush3.bf16.msra.mxu0 %v758_v2  ;;  %s979_s10 = smov 104   ;;  %s980_s5 = smov 48  }
  0x61   : > { %s981_s11 = smov 40  }
  0x63   : > { %655 = vmatmul.mubr.msk.bf16.vlgmr.msra.gmra.mrb[0].mxu0 %vm285_vm1, %v268_v3 }
 0x136   : > { %v323_v4 = vpop.f32.mrb[0].mxu0 }
 0x137   : > { %v329_v5 = vpack.c.bf16 %v323_v4, %v323_v4  ;;  %v656_v6 = vpop.f32.mrb[1].mxu0 }
 0x138   : > { %v326_v7 = vpop.f32.mrb[2].mxu0 }
 0x139   : > { %363 = vrot.lane.b32.xlu1 %v329_v5, %s971_s25  ;;  %335 = vrot.lane.b32.xlu0 %v329_v5, %s972_s12  ;;  %v657_v8 = vpop.f32.mrb[3].mxu0  ;;  %331 = vst.msk [vmem:[%s1174_s14] sm:$0xf] %vm330_vm2, %v329_v5  ;;  %s259_s25 = scalar_lea.vmem [#allocation8], %s1171_s23 }
 0x13a   : > { %s430_s12 = sshll.u32 %s259_s25, 4  ;;  %s1186_s12 = int_to_ptr.vmem [resolvable:$true] %s430_s12 }
 0x13d   : > { %378 = vrot.lane.b32.xlu1 %v329_v5, %s973_s26  ;;  %348 = vrot.lane.b32.xlu0 %v329_v5, %s974_s30  ;;  %s393_s26 = sand.u32 1, %s1042_s21   ;;  %s1182_s30 = sshll.u32 %s955_s18, 8 }
 0x13e   : > { %s1196_s18 = scalar_lea.sflag [#allocation9], %s393_s26  ;;  %s817_s21 = scalar_lea.vmem %s1186_s12, 256 }
 0x13f   : > { %p818_p6 = scmp.ne.s32.totalorder %s1186_s12, %s817_s21 }
 0x141   : > { %343 = vrot.lane.b32.xlu1 %v329_v5, %s975_s27  ;;  %339 = vrot.lane.b32.xlu0 %v329_v5, %s976_s13  ;;  %p819_p8 = pnand %p818_p6, %p1105_p10 }
 0x143   : > { %p820_p12 = pneg %p819_p8 }
 0x145   : > { %358 = vrot.lane.b32.xlu1 %v329_v5, %s977_s7  ;;  %353 = vrot.lane.b32.xlu0 %v329_v5, %s978_s9  ;;  %s1192_s9 = scalar_lea.hbm %s1340_s3, %s1182_s30 }
 0x149   : > { %373 = vrot.lane.b32.xlu1 %v329_v5, %s979_s10  ;;  %368 = vrot.lane.b32.xlu0 %v329_v5, %s980_s5  ;;  %s982_s10 = smov [#allocation8]  }
 0x14a   : > { %s821_s5 = sshll.u32 %s982_s10, 4  ;;  %s822_s5 = int_to_ptr.vmem [resolvable:$false] %s821_s5 }
 0x14b   : > { %p824_p11 = scmp.lt.s32.totalorder %s1186_s12, %s822_s5 }
 0x14d   : > { %383 = vrot.lane.b32.xlu0 %v329_v5, %s981_s11  ;;  %s823_s11 = scalar_lea.vmem %s822_s5, 512 }
 0x14e   : > { %p825_p0 = scmp.lt.s32.totalorder %s823_s11, %s817_s21 }
 0x150   : > { %p826_p5 = por %p825_p0, %p824_p11 }
 0x152   : > { %p827_p9 = pnand %p826_p5, %p820_p12 }
 0x1ab   : > { %v364_v9 = vpop.permute.xlu1 %363  ;;  %v336_v10 = vpop.permute.xlu0 %335 }
 0x1ac   : > { %627 = vst.msk [vmem:[%s259_s25 + $0x8] sm:$0xf] %vm330_vm2, %v364_v9  ;;  %338 = vst.msk [vmem:[%s259_s25] sm:$0xf] %vm330_vm2, %v336_v10 }
 0x1af   : > { %v379_v11 = vpop.permute.xlu1 %378  ;;  %v349_v12 = vpop.permute.xlu0 %348 }
 0x1b0   : > { %630 = vst.msk [vmem:[%s259_s25 + $0xc] sm:$0xf] %vm330_vm2, %v379_v11  ;;  %624 = vst.msk [vmem:[%s259_s25 + $0x4] sm:$0xf] %vm330_vm2, %v349_v12 }
 0x1b1   : > { %830 = shalt.err (!%p827_p9)
}
 0x1b2   : > { %s831_s25 = scalar_lea.hbm %s1192_s9, 256  ;;  %s835_s7 = scalar_lea.hbm %s1340_s3, 512 }
 0x1b3   : > { %p832_p1 = scmp.ne.s32.totalorder %s1192_s9, %s831_s25  ;;  %p836_p3 = scmp.lt.u32.totalorder %s1192_s9, %s1340_s3 }
 0x1b4   : > { %p837_p4 = scmp.lt.u32.totalorder %s835_s7, %s831_s25  ;;  %p839_p6 = scmp.lt.u32.totalorder %s831_s25, %s1192_s9 }
 0x1b5   : > { %p833_p2 = pnand %p832_p1, %p1105_p10 }
 0x1b6   : > { %p838_p13 = por %p837_p4, %p836_p3 }
 0x1b7   : > { %p834_p7 = pneg %p833_p2 }
 0x1b8   : > { %p840_p8 = por %p839_p6, %p838_p13 }
 0x1ba   : > { %p841_p12 = pnand %p840_p8, %p834_p7 }
 0x1bc   : > { %844 = shalt.err (!%p841_p12)
}
 0x1bd   : > { %s983_s21 = smov 4   ;;  %v344_v13 = vpop.permute.xlu1 %343  ;;  %v340_v14 = vpop.permute.xlu0 %339  ;;  %s1226_s11 = scalar_lea.vmem [#allocation10], %s1171_s23 }
 0x1be   : > { %665 = dma.vmem_to_hbm [thread:$0]  (%p1105_p10), %s1186_s12, 256, %s1192_s9, %s1196_s18, %s976_s13, %s976_s13, %s983_s21  }
 0x1bf   : > { %623 = vst.msk [vmem:[%s1174_s14 + $0x4] sm:$0xf] %vm330_vm2, %v344_v13  ;;  %342 = vst.msk [vmem:[%s1226_s11] sm:$0xf] %vm330_vm2, %v340_v14  ;;  %s413_s25 = sshll.u32 %s1174_s14, 4  ;;  %s1241_s23 = scalar_lea.hbm %s1339_s2, %s1182_s30  ;;  %s1235_s25 = int_to_ptr.vmem [resolvable:$true] %s413_s25 }
 0x1c0   : > { %s389_s27 = scalar_lea.sflag [#allocation4], %s1158_s28  ;;  %s845_s7 = scalar_lea.vmem %s1235_s25, 256 }
 0x1c1   : > { %v359_v15 = vpop.permute.xlu1 %358  ;;  %v354_v16 = vpop.permute.xlu0 %353  ;;  %p846_p11 = scmp.ne.s32.totalorder %s1235_s25, %s845_s7  ;;  %s984_s10 = smov [#allocation7]  }
 0x1c2   : > { %626 = vst.msk [vmem:[%s1174_s14 + $0x8] sm:$0xf] %vm330_vm2, %v359_v15  ;;  %625 = vst.msk [vmem:[%s1226_s11 + $0x4] sm:$0xf] %vm330_vm2, %v354_v16  ;;  %s849_s5 = sshll.u32 %s984_s10, 4  ;;  %s850_s5 = int_to_ptr.vmem [resolvable:$false] %s849_s5 }
 0x1c3   : > { %p847_p0 = pnand %p846_p11, %p1105_p10  ;;  %s851_s12 = scalar_lea.vmem %s850_s5, 512 }
 0x1c4   : > { %p852_p9 = scmp.lt.s32.totalorder %s1235_s25, %s850_s5  ;;  %p853_p1 = scmp.lt.s32.totalorder %s851_s12, %s845_s7 }
 0x1c5   : > { %v374_v17 = vpop.permute.xlu1 %373  ;;  %v369_v18 = vpop.permute.xlu0 %368  ;;  %p848_p5 = pneg %p847_p0 }
 0x1c6   : > { %629 = vst.msk [vmem:[%s1174_s14 + $0xc] sm:$0xf] %vm330_vm2, %v374_v17  ;;  %628 = vst.msk [vmem:[%s1226_s11 + $0x8] sm:$0xf] %vm330_vm2, %v369_v18  ;;  %p854_p2 = por %p853_p1, %p852_p9 }
 0x1c8   : > { %p855_p7 = pnand %p854_p2, %p848_p5 }
 0x1ca   : > { %858 = shalt.err (!%p855_p7)
}
 0x1cb   : > { %s859_s14 = scalar_lea.hbm %s1241_s23, 256  ;;  %s863_s10 = scalar_lea.hbm %s1339_s2, 512 }
 0x1cc   : > { %p860_p3 = scmp.ne.s32.totalorder %s1241_s23, %s859_s14  ;;  %p864_p6 = scmp.lt.u32.totalorder %s1241_s23, %s1339_s2 }
 0x1cd   : > { %p865_p8 = scmp.lt.u32.totalorder %s863_s10, %s859_s14  ;;  %p867_p11 = scmp.lt.u32.totalorder %s859_s14, %s1241_s23 }
 0x1ce   : > { %p861_p4 = pnand %p860_p3, %p1105_p10 }
 0x1cf   : > { %p866_p12 = por %p865_p8, %p864_p6 }
 0x1d0   : > { %p862_p13 = pneg %p861_p4 }
 0x1d1   : > { %p868_p0 = por %p867_p11, %p866_p12 }
 0x1d3   : > { %p869_p5 = pnand %p868_p0, %p862_p13 }
 0x1d5   : > { %872 = shalt.err (!%p869_p5)
}
 0x1d6   : > { %664 = dma.vmem_to_hbm [thread:$0]  (%p1105_p10), %s1235_s25, 256, %s1241_s23, %s389_s27, %s976_s13, %s976_s13, %s983_s21   ;;  %v384_v19 = vpop.permute.xlu0 %383 }
 0x1d7   : > { %s1358_s22 = sshll.u32 %s1226_s11, 4  ;;  %s1283_s12 = scalar_lea.hbm %s1341_s4, %s1182_s30  ;;  %631 = vst.msk [vmem:[%s1226_s11 + $0xc] sm:$0xf] %vm330_vm2, %v384_v19  ;;  %s1277_s22 = int_to_ptr.vmem [resolvable:$true] %s1358_s22 }
 0x1d8   : > { %s873_s28 = scalar_lea.vmem %s1277_s22, 256  ;;  %s985_s25 = smov [#allocation10]  }
 0x1d9   : > { %p874_p9 = scmp.ne.s32.totalorder %s1277_s22, %s873_s28  ;;  %s877_s23 = sshll.u32 %s985_s25, 4  ;;  %s878_s23 = int_to_ptr.vmem [resolvable:$false] %s877_s23 }
 0x1da   : > { %s879_s27 = scalar_lea.vmem %s878_s23, 512  ;;  %p880_p7 = scmp.lt.s32.totalorder %s1277_s22, %s878_s23 }
 0x1db   : > { %p875_p1 = pnand %p874_p9, %p1105_p10  ;;  %p881_p3 = scmp.lt.s32.totalorder %s879_s27, %s873_s28 }
 0x1dd   : > { %p876_p2 = pneg %p875_p1  ;;  %p882_p4 = por %p881_p3, %p880_p7 }
 0x1df   : > { %p883_p13 = pnand %p882_p4, %p876_p2 }
 0x1e1   : > { %886 = shalt.err (!%p883_p13)
}
 0x1e2   : > { %s887_s30 = scalar_lea.hbm %s1283_s12, 256  ;;  %s891_s9 = scalar_lea.hbm %s1341_s4, 512 }
 0x1e3   : > { %p888_p6 = scmp.ne.s32.totalorder %s1283_s12, %s887_s30  ;;  %p892_p11 = scmp.lt.u32.totalorder %s1283_s12, %s1341_s4 }
 0x1e4   : > { %p893_p0 = scmp.lt.u32.totalorder %s891_s9, %s887_s30  ;;  %p895_p9 = scmp.lt.u32.totalorder %s887_s30, %s1283_s12 }
 0x1e5   : > { %p889_p8 = pnand %p888_p6, %p1105_p10 }
 0x1e6   : > { %p894_p5 = por %p893_p0, %p892_p11 }
 0x1e7   : > { %p890_p12 = pneg %p889_p8 }
 0x1e8   : > { %p896_p1 = por %p895_p9, %p894_p5 }
 0x1ea   : > { %p897_p2 = pnand %p896_p1, %p890_p12 }
 0x1ec   : > { %900 = shalt.err (!%p897_p2)
}
 0x1ed   : > { %666 = dma.vmem_to_hbm [thread:$0]  (%p1105_p10), %s1277_s22, 256, %s1283_s12, %s1196_s18, %s976_s13, %s976_s13, %s983_s21  }
 0x1ee PF: > { %s462_s26 = sand.u32 1, %s943_s15   ;;  %p1359_p7 = scmp.ne.s32.totalorder %s1347_s24, 0 }
 0x1ef   : > { %p1360_p3 = scmp.ge.s32.totalorder %s963_s20, 2  ;;  %s463_s7 = scalar_lea.sflag [#allocation4], %s462_s26 }
 0x1f1   : > { %p679_p4 = pnand %p1360_p3, %p1359_p7 }
 0x1f3   : > { %934 = dma.done.wait (!%p679_p4), %s463_s7, 256  }
 0x1f4   : > { %936 = vsyncadd (!%p679_p4), %s463_s7, 4294967040  ;;  %s1361_s6 = sadd.s32 4294967294, %s963_s20  }
 0x1f5   : > { %s471_s28 = sand.u32 1, %s1361_s6  }
 0x1f6   : > { %s472_s25 = scalar_lea.sflag [#allocation9], %s471_s28 }
 0x1f7   : > { %938 = dma.done.wait (!%p679_p4), %s472_s25, 512  }
 0x1f8   : > { %940 = vsyncadd (!%p679_p4), %s472_s25, 4294966784  ;;  %s25_s20 = sadd.s32 1, %s963_s20   ;;  %s1362_s15 = smov %s947_s16 }
 0x1f9   : > { %p22_p10 = scmp.ge.s32.totalorder %s25_s20, 4   ;;  %s1363_s16 = smov %s951_s17 }
 0x1fa   : > { %s1364_s17 = smov %s1114_s8  ;;  %s1365_s18 = smov %s959_s19 }
 0x1fb   : > { %s1366_s19 = smov %s1368_s29  ;;  %24 = sbr.rel (!%p22_p10) target bundleno = 9 (0x9), region = 118 }
 0x202   :  { %486 = vsyncpa [#allocation3], 1 }
 0x203   :  { %488 = vsyncpa [#allocation3 + $0x1], 1 }
 0x204   :  { %489 = vsyncpa [#allocation6], 1 }
 0x205   :  { %490 = vsyncpa [#allocation4], 1 }
 0x206   :  { %492 = vsyncpa [#allocation4 + $0x1], 1 }
 0x207   :  { %493 = vsyncpa [#allocation9], 1 }
 0x208   :  { %495 = vsyncpa [#allocation9 + $0x1], 1 }

</bundles_post_ra>
